<compile_context>
chip_gen: v6e
topology: v6e:2x2x1
jax: 0.10.0
libtpu: 0.0.40
codegen_flags: <defaults>
</compile_context>

<pallas_src>
import functools

import jax
import jax.numpy as jnp
from jax import lax
from jax.experimental import pallas as pl
from jax.experimental.pallas import tpu as pltpu


# ------------------------------ helpers -------------------------------------


def _round_up(x, m):
    return (x + m - 1) // m * m


def _vmem_budget_bytes():
    """~75% of physical VMEM (headroom for compiler-internal scratch):
    ~48 MiB on v7x (64 MiB parts), ~96 MiB on v5e/v6e (128 MiB parts)."""
    try:
        cap = int(pltpu.get_tpu_info().vmem_capacity_bytes)
    except Exception:  # conservative fallback, safe on every generation
        cap = 64 * 1024 * 1024
    return (cap // 4) * 3


def _tile_candidates(dim):
    """Full dim first (preferred), then large 128-aligned divisors."""
    cands = [dim]
    for c in (2048, 1024, 512, 256, 128):
        if c < dim and dim % c == 0:
            cands.append(c)
    return cands


def _bb_candidates(batch):
    """Row-tile batch counts legal for the (8,128) sublane rule: the full
    batch, or any divisor that is a multiple of 8 (descending)."""
    cands = {batch}
    d = (batch // 8) * 8
    while d >= 8:
        if batch % d == 0:
            cands.add(d)
        d -= 8
    return sorted(cands, reverse=True)


def _footprint_bytes(bb, s_pad, tk, tn, k_pad, in_bytes, out_bytes):
    tm = bb * s_pad
    x = tm * tk * in_bytes
    t = tm * tn * in_bytes
    o = tm * tn * out_bytes
    wt = tk * tn * in_bytes
    acc = 0 if tk == k_pad else tm * tn * 4      # resident-w path drops the acc
    parts = 3 * bb * tn * 4
    bias = tn * 4
    # double-buffered pipeline streams + single-buffered f32 accumulator
    return 2 * (x + t + o + wt + parts + bias) + acc


def _select_tiles(batch, s_pad, k_pad, n_pad, budget, in_bytes, out_bytes):
    """Pick (bb, batch_pad, tk, tn).  Preference order (per perf review):
    single-N tile (x streamed from HBM exactly once) > resident w / full-K tile
    (no f32 accumulator, no k grid axis) > largest row tile that fits."""
    for b_cand in (batch, _round_up(batch, 8)):
        for tn in _tile_candidates(n_pad):
            for tk in _tile_candidates(k_pad):
                for bb in _bb_candidates(b_cand):
                    if bb * s_pad > 8192:        # keep per-grid-step size sane
                        continue
                    if _footprint_bytes(bb, s_pad, tk, tn, k_pad,
                                        in_bytes, out_bytes) <= budget:
                        return bb, b_cand, tk, tn
    b_pad = _round_up(batch, 8)
    return (_bb_candidates(b_pad)[-1], b_pad,
            _tile_candidates(k_pad)[-1], _tile_candidates(n_pad)[-1])


def _pick_loss_tile(b_pad, n_pad, budget):
    for tb in _bb_candidates(b_pad):
        if 6 * tb * n_pad * 4 <= budget:
            return tb
    return _bb_candidates(b_pad)[-1]


# ------------------------------ kernels -------------------------------------


def _finalize_tile(out_f32, t_ref, o_ref, dp_ref, so_ref, st_ref, *,
                   bb, s_pad, s_valid):
    """Store the output tile and the fused cosine partials.

    The dim=1 (sequence) reductions dot(o,t), ||o||^2, ||t||^2 are taken from
    the f32 output tile while it is still in VMEM, so the [B, S, N] activation
    is never re-read from HBM for the loss."""
    tn = out_f32.shape[-1]
    o_ref[...] = out_f32.astype(o_ref.dtype)     # bf16 store halves the write
    o3 = out_f32.reshape(bb, s_pad, tn)
    t3 = t_ref[...].astype(jnp.float32).reshape(bb, s_pad, tn)
    if s_valid != s_pad:
        # Mask seq-padding rows (their output equals the bias, which would
        # otherwise leak into ||o||^2).  to_embeds padding rows are zero.
        smask = lax.broadcasted_iota(jnp.int32, (s_pad, tn), 0) < s_valid
        o3 = jnp.where(smask[None], o3, 0.0)
    dp_ref[...] = jnp.sum(o3 * t3, axis=1)
    so_ref[...] = jnp.sum(o3 * o3, axis=1)
    st_ref[...] = jnp.sum(t3 * t3, axis=1)


def _linear_cos_kernel_resident_w(x_ref, w_ref, b_ref, t_ref,
                                  o_ref, dp_ref, so_ref, st_ref, *,
                                  bb, s_pad, s_valid):
    """Single K tile: w is resident, no accumulator scratch needed."""
    out = jnp.dot(x_ref[...], w_ref[...],
                  preferred_element_type=jnp.float32) + b_ref[...]
    _finalize_tile(out, t_ref, o_ref, dp_ref, so_ref, st_ref,
                   bb=bb, s_pad=s_pad, s_valid=s_valid)


def _linear_cos_kernel_tiled_k(x_ref, w_ref, b_ref, t_ref,
                               o_ref, dp_ref, so_ref, st_ref, acc_ref, *,
                               bb, s_pad, s_valid):
    """K tiled: f32 VMEM accumulator, init at k==0, finalize at k==last."""
    k = pl.program_id(2)

    @pl.when(k == 0)
    def _init():
        acc_ref[...] = jnp.zeros_like(acc_ref)

    acc_ref[...] += jnp.dot(x_ref[...], w_ref[...],
                            preferred_element_type=jnp.float32)

    @pl.when(k == pl.num_programs(2) - 1)
    def _fin():
        _finalize_tile(acc_ref[...] + b_ref[...], t_ref,
                       o_ref, dp_ref, so_ref, st_ref,
                       bb=bb, s_pad=s_pad, s_valid=s_valid)


def _cosine_loss_kernel(dp_ref, so_ref, st_ref, loss_ref, *,
                        tb, b_valid, b_pad, n_valid, n_pad, denom, eps):
    """Reduce the [B, N] cosine partials to loss = mean(1 - cos)."""
    i = pl.program_id(0)

    @pl.when(i == 0)
    def _init():
        loss_ref[0, 0] = 0.0

    prod = so_ref[...] * st_ref[...]
    # Clamp the product of (squared) norms -- torch cosine_similarity's eps
    # convention; rsqrt goes to the otherwise-idle EUP slot.
    cos = dp_ref[...] * lax.rsqrt(jnp.maximum(prod, eps * eps))
    contrib = 1.0 - cos
    if n_valid != n_pad:                     # drop N padding columns
        col = lax.broadcasted_iota(jnp.int32, contrib.shape, 1)
        contrib = jnp.where(col < n_valid, contrib, 0.0)
    if b_valid != b_pad:                     # drop padded batch rows
        row = lax.broadcasted_iota(jnp.int32, contrib.shape, 0) + i * tb
        contrib = jnp.where(row < b_valid, contrib, 0.0)
    loss_ref[0, 0] += jnp.sum(contrib)

    @pl.when(i == pl.num_programs(0) - 1)
    def _scale():
        loss_ref[0, 0] = loss_ref[0, 0] * (1.0 / denom)


# ------------------------------ wrappers ------------------------------------


def linear_cosine_forward(from_embeds, to_embeds, w, b, *, compute_loss=True,
                          eps=1e-8, tile_vmem_budget=None):
    """output = from_embeds @ w + b ;  loss = mean(1 - cos_sim(output, to, dim=1))."""
    B, S, K = from_embeds.shape
    Kw, N = w.shape
    assert Kw == K, (Kw, K)

    s_pad = _round_up(S, 8)          # sublane alignment of the seq axis
    k_pad = _round_up(K, 128)        # MXU/lane-aligned contraction
    n_pad = _round_up(N, 128)        # lane-dense output stores

    out_dtype = from_embeds.dtype    # bf16 in -> bf16 out (halved write stream)
    in_bytes = jnp.dtype(from_embeds.dtype).itemsize
    out_bytes = jnp.dtype(out_dtype).itemsize

    hw_budget = _vmem_budget_bytes()
    tile_budget = tile_vmem_budget if tile_vmem_budget is not None else hw_budget
    bb, b_pad, tk, tn = _select_tiles(B, s_pad, k_pad, n_pad, tile_budget,
                                      in_bytes, out_bytes)

    # Pad only what is actually misaligned.  For FlanT5 shapes (S=32, hidden
    # dims multiples of 128) none of these copies happen: the activations go
    # straight from the embedding gather into the kernel.
    x, t = from_embeds, to_embeds
    if s_pad != S or k_pad != K or b_pad != B:
        x = jnp.pad(x, ((0, b_pad - B), (0, s_pad - S), (0, k_pad - K)))
    if s_pad != S or n_pad != N or b_pad != B:
        t = jnp.pad(t, ((0, b_pad - B), (0, s_pad - S), (0, n_pad - N)))
    w_p = w if (k_pad == K and n_pad == N) else jnp.pad(
        w, ((0, k_pad - K), (0, n_pad - N)))
    b_p = b.astype(jnp.float32).reshape(1, N)
    if n_pad != N:
        b_p = jnp.pad(b_p, ((0, 0), (0, n_pad - N)))

    x_flat = x.reshape(b_pad * s_pad, k_pad)   # free reshape (contiguous)
    t_flat = t.reshape(b_pad * s_pad, n_pad)

    tm = bb * s_pad
    grid = (b_pad // bb, n_pad // tn, k_pad // tk)
    resident_w = (tk == k_pad)

    if resident_w:
        kernel = functools.partial(_linear_cos_kernel_resident_w,
                                   bb=bb, s_pad=s_pad, s_valid=S)
        scratch = []                                       # no acc needed
    else:
        kernel = functools.partial(_linear_cos_kernel_tiled_k,
                                   bb=bb, s_pad=s_pad, s_valid=S)
        scratch = [pltpu.VMEM((tm, tn), jnp.float32)]      # f32 accumulator

    out_flat, dp, so, st = pl.pallas_call(
        kernel,
        grid_spec=pltpu.PrefetchScalarGridSpec(
            num_scalar_prefetch=0,
            grid=grid,
            in_specs=[
                pl.BlockSpec((tm, tk), lambda i, j, k: (i, k)),   # x
                pl.BlockSpec((tk, tn), lambda i, j, k: (k, j)),   # w
                pl.BlockSpec((1, tn), lambda i, j, k: (0, j)),    # bias (f32)
                pl.BlockSpec((tm, tn), lambda i, j, k: (i, j)),   # to_embeds
            ],
            out_specs=[
                pl.BlockSpec((tm, tn), lambda i, j, k: (i, j)),   # output
                pl.BlockSpec((bb, tn), lambda i, j, k: (i, j)),   # dot(o, t)
                pl.BlockSpec((bb, tn), lambda i, j, k: (i, j)),   # ||o||^2
                pl.BlockSpec((bb, tn), lambda i, j, k: (i, j)),   # ||t||^2
            ],
            scratch_shapes=scratch,
        ),
        out_shape=(
            jax.ShapeDtypeStruct((b_pad * s_pad, n_pad), out_dtype),
            jax.ShapeDtypeStruct((b_pad, n_pad), jnp.float32),
            jax.ShapeDtypeStruct((b_pad, n_pad), jnp.float32),
            jax.ShapeDtypeStruct((b_pad, n_pad), jnp.float32),
        ),
        compiler_params=pltpu.CompilerParams(
            dimension_semantics=("parallel", "parallel", "arbitrary"),
            vmem_limit_bytes=hw_budget,
        ),
    )(x_flat, w_p, b_p, t_flat)

    output = out_flat.reshape(b_pad, s_pad, n_pad)
    if (b_pad, s_pad, n_pad) != (B, S, N):
        output = output[:B, :S, :N]   # slice copy only on the padded path

    if not compute_loss:
        return output, None

    tb = _pick_loss_tile(b_pad, n_pad, tile_budget)
    loss = pl.pallas_call(
        functools.partial(_cosine_loss_kernel, tb=tb, b_valid=B, b_pad=b_pad,
                          n_valid=N, n_pad=n_pad, denom=float(B * N), eps=eps),
        grid=(b_pad // tb,),
        in_specs=[pl.BlockSpec((tb, n_pad), lambda i: (i, 0))] * 3,
        out_specs=pl.BlockSpec(memory_space=pltpu.MemorySpace.SMEM),
        out_shape=jax.ShapeDtypeStruct((1, 1), jnp.float32),
        compiler_params=pltpu.CompilerParams(
            dimension_semantics=("arbitrary",)),
    )(dp, so, st)[0, 0]

    return output, loss


def linear_model_forward(captions, from_table, to_table, w, b, training=True):
    """Forward of LinearModel.

    captions:   int32 [B, S] token ids
    from_table: [V, D_from]  frozen "from" embedding table (ideally bf16)
    to_table:   [V, D_to]    frozen "to" embedding table   (ideally bf16)
    w:          [D_from, D_to] Linear weight (in x out)
    b:          [1, D_to] or [D_to] bias
    """
    # Frozen-embedding lookups.
    # TODO(synk): fuse this gather into the matmul kernel (scalar-prefetch the
    # token ids + per-row DMA from the HBM tables) to avoid materializing the
    # [B, S, D] activations in HBM at all.
    from_embeds = jnp.take(from_table, captions, axis=0)     # [B, S, D_from]
    to_embeds = jnp.take(to_table, captions, axis=0)         # [B, S, D_to]

    output, loss = linear_cosine_forward(from_embeds, to_embeds, w, b,
                                         compute_loss=training)
    if training:
        return output, loss
    return output


# -------------------------------- main ---------------------------------------

if __name__ == "__main__":
    def reference_forward(from_e, to_e, w, bias, eps=1e-8):
        f = from_e.astype(jnp.float32)
        t = to_e.astype(jnp.float32)
        out = f @ w.astype(jnp.float32) + bias.astype(jnp.float32).reshape(-1)
        dot = jnp.sum(out * t, axis=1)                       # dim=1 (seq)
        nrm = jnp.sum(out * out, axis=1) * jnp.sum(t * t, axis=1)
        loss = jnp.mean(1.0 - dot / jnp.sqrt(jnp.maximum(nrm, eps * eps)))
        return out, loss

    key = jax.random.PRNGKey(0)
    (k1, k2, k3, k4, k5, k6, k7, k8, k9, k10, k11, k12) = jax.random.split(key, 12)

    # ---- Test 1: bf16 end-to-end, 128-aligned dims (FlanT5-like fast path:
    # no wrapper padding/casting, single-N tile, resident w). -----------------
    B, S, V, D_FROM, D_TO = 2, 8, 64, 256, 128
    from_table = jax.random.normal(k1, (V, D_FROM), jnp.float32).astype(jnp.bfloat16)
    to_table = jax.random.normal(k2, (V, D_TO), jnp.float32).astype(jnp.bfloat16)
    w_pt = jax.random.normal(k3, (D_TO, D_FROM), jnp.float32) / jnp.sqrt(
        jnp.float32(D_FROM))
    bias = 0.01 * jax.random.normal(k4, (D_TO,), jnp.float32)
    captions = jax.random.randint(k5, (B, S), 0, V, dtype=jnp.int32)
    w = w_pt.T.astype(jnp.bfloat16)           # [D_FROM, D_TO], bf16 weights
    b = bias.reshape(1, D_TO)                 # bias stays f32 (tiny)

    out1, loss1 = linear_model_forward(captions, from_table, to_table, w, b,
                                       training=True)
    jax.block_until_ready((out1, loss1))
    ref_out1, ref_loss1 = reference_forward(from_table[captions],
                                            to_table[captions], w, bias)
    assert out1.shape == (B, S, D_TO) and out1.dtype == jnp.bfloat16
    assert jnp.allclose(out1.astype(jnp.float32), ref_out1, atol=5e-2, rtol=5e-2)
    assert jnp.allclose(loss1, ref_loss1, atol=1e-3, rtol=1e-3)

    # ---- Test 2: f32, misaligned dims + odd seq len (padding / mask path). --
    B2, S2, V2, D_FROM2, D_TO2 = 3, 5, 32, 40, 48
    from_table2 = jax.random.normal(k6, (V2, D_FROM2), jnp.float32)
    to_table2 = jax.random.normal(k7, (V2, D_TO2), jnp.float32)
    w2 = (jax.random.normal(k8, (D_TO2, D_FROM2), jnp.float32)
          / jnp.sqrt(jnp.float32(D_FROM2))).T
    bias2 = 0.01 * jax.random.normal(k9, (D_TO2,), jnp.float32)
    captions2 = jax.random.randint(k10, (B2, S2), 0, V2, dtype=jnp.int32)

    out2, loss2 = linear_model_forward(captions2, from_table2, to_table2,
                                       w2, bias2.reshape(1, D_TO2),
                                       training=True)
    jax.block_until_ready((out2, loss2))
    ref_out2, ref_loss2 = reference_forward(from_table2[captions2],
                                            to_table2[captions2], w2, bias2)
    assert out2.shape == (B2, S2, D_TO2) and out2.dtype == jnp.float32
    assert jnp.allclose(out2, ref_out2, atol=1e-4, rtol=1e-4)
    assert jnp.allclose(loss2, ref_loss2, atol=1e-4, rtol=1e-4)

    # ---- Test 3: force the K/N-tiled accumulator path with a tiny tile
    # budget (exercises the multi-k kernel that very large models would use). -
    B3, S3, D_FROM3, D_TO3 = 2, 8, 256, 256
    from_e3 = jax.random.normal(k11, (B3, S3, D_FROM3), jnp.float32).astype(jnp.bfloat16)
    to_e3 = jax.random.normal(k12, (B3, S3, D_TO3), jnp.float32).astype(jnp.bfloat16)
    w3 = (jax.random.normal(k3, (D_FROM3, D_TO3), jnp.float32)
          / jnp.sqrt(jnp.float32(D_FROM3))).astype(jnp.bfloat16)
    b3 = jnp.zeros((1, D_TO3), jnp.float32)
    out3, loss3 = linear_cosine_forward(from_e3, to_e3, w3, b3,
                                        compute_loss=True,
                                        tile_vmem_budget=128 * 1024)
    jax.block_until_ready((out3, loss3))
    ref_out3, ref_loss3 = reference_forward(
        from_e3, to_e3, w3, jnp.zeros((D_TO3,), jnp.float32))
    assert out3.shape == (B3, S3, D_TO3)
    assert jnp.allclose(out3.astype(jnp.float32), ref_out3, atol=5e-2, rtol=5e-2)
    assert jnp.allclose(loss3, ref_loss3, atol=1e-3, rtol=1e-3)

    print("KERNEL_OK")
</pallas_src>

<mosaic_0001>
module attributes {stable_mosaic.version = 11 : i64} {
  func.func @_linear_cos_kernel_resident_w(%arg0: i32, %arg1: i32, %arg2: i32, %arg3: memref<16x256xbf16, #tpu.memory_space<vmem>>, %arg4: memref<256x128xbf16, #tpu.memory_space<vmem>>, %arg5: memref<1x128xf32, #tpu.memory_space<vmem>>, %arg6: memref<16x128xbf16, #tpu.memory_space<vmem>>, %arg7: memref<16x128xbf16, #tpu.memory_space<vmem>>, %arg8: memref<2x128xf32, #tpu.memory_space<vmem>>, %arg9: memref<2x128xf32, #tpu.memory_space<vmem>>, %arg10: memref<2x128xf32, #tpu.memory_space<vmem>>) attributes {dimension_semantics = [#tpu.dimension_semantics<parallel>, #tpu.dimension_semantics<parallel>, #tpu.dimension_semantics<arbitrary>], iteration_bounds = array<i64: 1, 1, 1>, scalar_prefetch = 0 : i64, scratch_operands = 0 : i64, tpu.core_type = #tpu.core_type<tc>, window_params = [{transform_indices = @transform_0, window_bounds = array<i64: 16, 256>}, {transform_indices = @transform_1, window_bounds = array<i64: 256, 128>}, {transform_indices = @transform_2, window_bounds = array<i64: 1, 128>}, {transform_indices = @transform_3, window_bounds = array<i64: 16, 128>}, {transform_indices = @transform_4, window_bounds = array<i64: 16, 128>}, {transform_indices = @transform_5, window_bounds = array<i64: 2, 128>}, {transform_indices = @transform_6, window_bounds = array<i64: 2, 128>}, {transform_indices = @transform_7, window_bounds = array<i64: 2, 128>}]} {
    %c0 = arith.constant 0 : index
    %c0_0 = arith.constant 0 : index
    %0 = vector.load %arg3[%c0, %c0_0] : memref<16x256xbf16, #tpu.memory_space<vmem>>, vector<16x256xbf16>
    %c0_1 = arith.constant 0 : index
    %c0_2 = arith.constant 0 : index
    %1 = vector.load %arg4[%c0_1, %c0_2] : memref<256x128xbf16, #tpu.memory_space<vmem>>, vector<256x128xbf16>
    %cst = arith.constant dense<0.000000e+00> : vector<16x128xf32>
    %2 = tpu.matmul %0, %1, %cst {dimension_numbers = #tpu.dot_dimension_numbers<[1], [0], [0], [1], [0, 0, 1, 1], [], []>} : vector<16x256xbf16>, vector<256x128xbf16>, vector<16x128xf32> -> vector<16x128xf32>
    %c0_3 = arith.constant 0 : index
    %c0_4 = arith.constant 0 : index
    %3 = vector.load %arg5[%c0_3, %c0_4] : memref<1x128xf32, #tpu.memory_space<vmem>>, vector<1x128xf32>
    %4 = vector.broadcast %3 : vector<1x128xf32> to vector<16x128xf32>
    %5 = arith.addf %2, %4 : vector<16x128xf32>
    %6 = arith.truncf %5 : vector<16x128xf32> to vector<16x128xbf16>
    %c0_5 = arith.constant 0 : index
    %c0_6 = arith.constant 0 : index
    %7 = vector.load %arg7[%c0_5, %c0_6] : memref<16x128xbf16, #tpu.memory_space<vmem>>, vector<16x128xbf16>
    tpu.vector_store %arg7[%c0_5, %c0_6], %6 {strides = array<i32>} : memref<16x128xbf16, #tpu.memory_space<vmem>>, vector<16x128xbf16>,
    %8 = vector.shape_cast %5 : vector<16x128xf32> to vector<2x8x128xf32>
    %c0_7 = arith.constant 0 : index
    %c0_8 = arith.constant 0 : index
    %9 = vector.load %arg6[%c0_7, %c0_8] : memref<16x128xbf16, #tpu.memory_space<vmem>>, vector<16x128xbf16>
    %10 = arith.extf %9 : vector<16x128xbf16> to vector<16x128xf32>
    %11 = vector.shape_cast %10 : vector<16x128xf32> to vector<2x8x128xf32>
    %12 = arith.mulf %8, %11 : vector<2x8x128xf32>
    %cst_9 = arith.constant dense<0.000000e+00> : vector<2x128xf32>
    %13 = vector.multi_reduction <add>, %12, %cst_9 [1] : vector<2x8x128xf32> to vector<2x128xf32>
    %c0_10 = arith.constant 0 : index
    %c0_11 = arith.constant 0 : index
    %14 = vector.load %arg8[%c0_10, %c0_11] : memref<2x128xf32, #tpu.memory_space<vmem>>, vector<2x128xf32>
    tpu.vector_store %arg8[%c0_10, %c0_11], %13 {strides = array<i32>} : memref<2x128xf32, #tpu.memory_space<vmem>>, vector<2x128xf32>,
    %15 = arith.mulf %8, %8 : vector<2x8x128xf32>
    %cst_12 = arith.constant dense<0.000000e+00> : vector<2x128xf32>
    %16 = vector.multi_reduction <add>, %15, %cst_12 [1] : vector<2x8x128xf32> to vector<2x128xf32>
    %c0_13 = arith.constant 0 : index
    %c0_14 = arith.constant 0 : index
    %17 = vector.load %arg9[%c0_13, %c0_14] : memref<2x128xf32, #tpu.memory_space<vmem>>, vector<2x128xf32>
    tpu.vector_store %arg9[%c0_13, %c0_14], %16 {strides = array<i32>} : memref<2x128xf32, #tpu.memory_space<vmem>>, vector<2x128xf32>,
    %18 = arith.mulf %11, %11 : vector<2x8x128xf32>
    %cst_15 = arith.constant dense<0.000000e+00> : vector<2x128xf32>
    %19 = vector.multi_reduction <add>, %18, %cst_15 [1] : vector<2x8x128xf32> to vector<2x128xf32>
    %c0_16 = arith.constant 0 : index
    %c0_17 = arith.constant 0 : index
    %20 = vector.load %arg10[%c0_16, %c0_17] : memref<2x128xf32, #tpu.memory_space<vmem>>, vector<2x128xf32>
    tpu.vector_store %arg10[%c0_16, %c0_17], %19 {strides = array<i32>} : memref<2x128xf32, #tpu.memory_space<vmem>>, vector<2x128xf32>,
    return
  }
  func.func @transform_0(%arg0: i32, %arg1: i32, %arg2: i32) -> (i32, i32) {
    %c0_i32 = arith.constant 0 : i32
    return %arg0, %arg2 : i32, i32
  }
  func.func @transform_1(%arg0: i32, %arg1: i32, %arg2: i32) -> (i32, i32) {
    %c0_i32 = arith.constant 0 : i32
    return %arg2, %arg1 : i32, i32
  }
  func.func @transform_2(%arg0: i32, %arg1: i32, %arg2: i32) -> (i32, i32) {
    %c0_i32 = arith.constant 0 : i32
    %c0_i32_0 = arith.constant 0 : i32
    return %c0_i32, %arg1 : i32, i32
  }
  func.func @transform_3(%arg0: i32, %arg1: i32, %arg2: i32) -> (i32, i32) {
    %c0_i32 = arith.constant 0 : i32
    return %arg0, %arg1 : i32, i32
  }
  func.func @transform_4(%arg0: i32, %arg1: i32, %arg2: i32) -> (i32, i32) {
    %c0_i32 = arith.constant 0 : i32
    return %arg0, %arg1 : i32, i32
  }
  func.func @transform_5(%arg0: i32, %arg1: i32, %arg2: i32) -> (i32, i32) {
    %c0_i32 = arith.constant 0 : i32
    return %arg0, %arg1 : i32, i32
  }
  func.func @transform_6(%arg0: i32, %arg1: i32, %arg2: i32) -> (i32, i32) {
    %c0_i32 = arith.constant 0 : i32
    return %arg0, %arg1 : i32, i32
  }
  func.func @transform_7(%arg0: i32, %arg1: i32, %arg2: i32) -> (i32, i32) {
    %c0_i32 = arith.constant 0 : i32
    return %arg0, %arg1 : i32, i32
  }
}

</mosaic_0001>

<bundles_post_ra>
// kernel: tpu_custom_call.1
= control target key start
LH: loop header
LB: loop body
LE: loop exit
PB: predicated region body
PF: predicated region fallthrough
CT: control target
= control target key end

     0   :  { %13 = vsyncpa [#allocation3], 0  ;;  %s706_s0 = inlined_call_operand.hbm [shape: bf16[16,256], index: 0, kind: input, shape index: {}]   ;;  %s707_s1 = inlined_call_operand.hbm [shape: bf16[256,128], index: 1, kind: input, shape index: {}]   ;;  %s708_s2 = inlined_call_operand.vmem [shape: f32[1,128], index: 2, kind: input, shape index: {}]   ;;  %s709_s3 = inlined_call_operand.hbm [shape: bf16[16,128], index: 3, kind: input, shape index: {}]   ;;  %s710_s4 = inlined_call_operand.hbm [shape: bf16[16,128], index: 4, kind: output, shape index: {0}]   ;;  %s711_s5 = inlined_call_operand.hbm [shape: f32[2,128], index: 5, kind: output, shape index: {1}]   ;;  %s712_s6 = inlined_call_operand.hbm [shape: f32[2,128], index: 6, kind: output, shape index: {2}]   ;;  %s713_s7 = inlined_call_operand.hbm [shape: f32[2,128], index: 7, kind: output, shape index: {3}]  }
   0x1   :  { %14 = vsyncpa [#allocation6], 0 }
   0x2   :  { %15 = vsyncpa [#allocation4], 0 }
   0x3   :  { %16 = vsyncpa [#allocation10], 0 }
   0x4   :  { %17 = vsyncpa [#allocation13], 0  ;;  %s619_s24 = smov [#allocation5]  }
   0x5   :  { %s35_s25 = sshll.u32 %s619_s24, 4  ;;  %s36_s25 = int_to_ptr.vmem [resolvable:$true] %s35_s25 }
   0x6   :  { %s477_s26 = scalar_lea.vmem %s36_s25, 2048  ;;  %p482_p1 = scmp.lt.s32.totalorder %s36_s25, %s36_s25 }
   0x7   :  { %p478_p0 = scmp.ne.s32.totalorder %s36_s25, %s477_s26  ;;  %p483_p2 = scmp.lt.s32.totalorder %s477_s26, %s477_s26 }
   0x9   :  { %p484_p3 = por %p483_p2, %p482_p1 }
   0xb   :  { %p485_p4 = pnand %p484_p3, %p478_p0 }
   0xd   :  { %488 = shalt.err (!%p485_p4)
}
   0xe   :  { %s620_s27 = smov 64   ;;  %s621_s28 = smov 4  }
   0xf   :  { %41 = dma.hbm_to_vmem [thread:$0]  %s707_s1, 2048, %s36_s25, [#allocation6], %s620_s27, %s620_s27, %s621_s28  }
  0x10   :  { %s622_s8 = smov [#allocation2]  }
  0x11   :  { %s23_s9 = sshll.u32 %s622_s8, 4  ;;  %s24_s9 = int_to_ptr.vmem [resolvable:$true] %s23_s9 }
  0x12   :  { %s497_s10 = scalar_lea.vmem %s24_s9, 256  ;;  %p502_p6 = scmp.lt.s32.totalorder %s24_s9, %s24_s9 }
  0x13   :  { %p498_p5 = scmp.ne.s32.totalorder %s24_s9, %s497_s10  ;;  %p503_p7 = scmp.lt.s32.totalorder %s497_s10, %s497_s10 }
  0x15   :  { %p504_p8 = por %p503_p7, %p502_p6 }
  0x17   :  { %p505_p9 = pnand %p504_p8, %p498_p5 }
  0x19   :  { %508 = shalt.err (!%p505_p9)
}
  0x1a   :  { %s623_s11 = smov 128   ;;  %s624_s12 = smov 8  }
  0x1b   :  { %29 = dma.hbm_to_vmem [thread:$0]  %s706_s0, 256, %s24_s9, [#allocation3], %s623_s11, %s623_s11, %s624_s12  }
  0x1c   :  { %s625_s15 = smov [#allocation7]  }
  0x1d   :  { %s49_s16 = sshll.u32 %s625_s15, 4  ;;  %s50_s16 = int_to_ptr.vmem [resolvable:$true] %s49_s16 }
  0x1e   :  { %s517_s1 = scalar_lea.vmem %s50_s16, 128  ;;  %p522_p11 = scmp.lt.s32.totalorder %s50_s16, %s50_s16 }
  0x1f   :  { %p518_p10 = scmp.ne.s32.totalorder %s50_s16, %s517_s1  ;;  %p523_p12 = scmp.lt.s32.totalorder %s517_s1, %s517_s1 }
  0x21   :  { %p524_p13 = por %p523_p12, %p522_p11 }
  0x23   :  { %p525_p0 = pnand %p524_p13, %p518_p10 }
  0x25   :  { %528 = shalt.err (!%p525_p0)
}
  0x26   :  { %55 = dma.hbm_to_vmem [thread:$0]  %s709_s3, 128, %s50_s16, [#allocation6], %s620_s27, %s620_s27, %s621_s28  }
  0x27   :  { %609 = dma.done.wait [#allocation3], 256  }
  0x28   :  { %610 = vsyncadd [#allocation3], 4294967040 }
  0x29   :  { %611 = dma.done.wait [#allocation6], 2176  }
  0x2a   :  { %612 = vsyncadd [#allocation6], 4294965120  ;;  %v450_v0 = vld [vmem:[#allocation5 + $0x78] sm:$0xff]   ;;  %v452_v2 = vld [vmem:[#allocation5 + $0x70] sm:$0xff]   ;;  %vm284_vm0 = vcmask 1041409   ;;  %s626_s0 = smov [#allocation12]  }
  0x2b   :  { %v451_v1 = vld [vmem:[#allocation5 + $0x38] sm:$0xff]   ;;  %417 = vmatprep.subr.bf16.mxu0 %v450_v0  ;;  %v453_v3 = vld [vmem:[#allocation5 + $0x30] sm:$0xff]   ;;  %v454_v4 = vld [vmem:[#allocation5 + $0x68] sm:$0xff]   ;;  %s364_s3 = sshll.u32 %s626_s0, 4  ;;  %s365_s3 = int_to_ptr.vmem [resolvable:$true] %s364_s3 }
  0x2c   :  { %418 = vmatpush3.bf16.msra.mxu0 %v451_v1  ;;  %v455_v5 = vld [vmem:[#allocation5 + $0x28] sm:$0xff]   ;;  %v456_v6 = vld [vmem:[#allocation5 + $0x60] sm:$0xff]   ;;  %v458_v8 = vld [vmem:[#allocation5 + $0x58] sm:$0xff]   ;;  %s529_s19 = scalar_lea.vmem %s365_s3, 32  ;;  %p534_p2 = scmp.lt.s32.totalorder %s365_s3, %s365_s3 }
  0x2d   :  { %419 = vmatprep.subr.bf16.mxu0 %v452_v2  ;;  %v457_v7 = vld [vmem:[#allocation5 + $0x20] sm:$0xff]   ;;  %v459_v9 = vld [vmem:[#allocation5 + $0x18] sm:$0xff]   ;;  %v460_v10 = vld [vmem:[#allocation5 + $0x50] sm:$0xff]   ;;  %p530_p1 = scmp.ne.s32.totalorder %s365_s3, %s529_s19  ;;  %p535_p3 = scmp.lt.s32.totalorder %s529_s19, %s529_s19 }
  0x2e   :  { %v468_v11 = vld [vmem:[#allocation2 + $0x4] ss:$8 sps:$4 sm:$0xff]   ;;  %v462_v13 = vld [vmem:[#allocation5 + $0x48] sm:$0xff]   ;;  %v464_v15 = vld [vmem:[#allocation5 + $0x40] sm:$0xff]  }
  0x2f   :  { %v461_v12 = vld [vmem:[#allocation5 + $0x10] sm:$0xff]   ;;  %245 = vmatprep.mubr.bf16.mxu0 %v468_v11  ;;  %v463_v14 = vld [vmem:[#allocation5 + $0x8] sm:$0xff]   ;;  %v465_v16 = vld [vmem:[#allocation5] sm:$0xff]   ;;  %p536_p4 = por %p535_p3, %p534_p2 }
  0x30   :  { %420 = vmatpush3.bf16.msra.mxu0 %v453_v3  ;;  %v466_v17 = vld [vmem:[#allocation2] ss:$8 sps:$4 sm:$0xff]   ;;  %v414_v18 = vld [vmem:[#allocation7] sm:$0xff]  }
  0x31   :  { %421 = vmatprep.subr.bf16.mxu0 %v454_v4  ;;  %v416_v19 = vunpack.c.h.bf16 %v414_v18  ;;  %v415_v20 = vunpack.c.l.bf16 %v414_v18  ;;  %p537_p5 = pnand %p536_p4, %p530_p1 }
  0x33   :  { %v307_v21 = vmul.f32 %v415_v20, %v415_v20  ;;  %v308_v22 = vmul.f32 %v416_v19, %v416_v19 }
  0x34   :  { %422 = vmatpush3.bf16.msra.mxu0 %v455_v5 }
  0x35   :  { %423 = vmatprep.subr.bf16.mxu0 %v456_v6  ;;  %v309_v23 = vrot.slane %v307_v21, 4  ;;  %v315_v24 = vrot.slane %v308_v22, 4 }
  0x37   :  { %v310_v25 = vadd.f32 %v309_v23, %v307_v21  ;;  %v316_v26 = vadd.f32 %v315_v24, %v308_v22 }
  0x38   :  { %424 = vmatpush3.bf16.msra.mxu0 %v457_v7 }
  0x39   :  { %425 = vmatprep.subr.bf16.mxu0 %v458_v8  ;;  %v311_v27 = vrot.slane %v310_v25, 2  ;;  %v317_v28 = vrot.slane %v316_v26, 2 }
  0x3b   :  { %v312_v29 = vadd.f32 %v311_v27, %v310_v25  ;;  %v318_v30 = vadd.f32 %v317_v28, %v316_v26 }
  0x3c   :  { %426 = vmatpush3.bf16.msra.mxu0 %v459_v9 }
  0x3d   :  { %427 = vmatprep.subr.bf16.mxu0 %v460_v10  ;;  %v313_v31 = vrot.slane %v312_v29, 1  ;;  %v319_v32 = vrot.slane %v318_v30, 1 }
  0x3f   :  { %v314_v33 = vadd.f32 %v313_v31, %v312_v29  ;;  %v320_v34 = vadd.f32 %v319_v32, %v318_v30 }
  0x40   :  { %428 = vmatpush3.bf16.msra.mxu0 %v461_v12 }
  0x41   :  { %429 = vmatprep.subr.bf16.mxu0 %v462_v13  ;;  %v323_v35 = vsel %vm284_vm0, %v320_v34, %v314_v33 }
  0x42   :  { %325 = vst [vmem:[#allocation12] sm:$0x3] %v323_v35 }
  0x44   :  { %430 = vmatpush3.bf16.msra.mxu0 %v463_v14 }
  0x45   :  { %431 = vmatprep.subr.bf16.mxu0 %v464_v15 }
  0x48   :  { %432 = vmatpush3.bf16.msra.mxu0 %v465_v16 }
  0x4b   :  { %246 = vmatmul.mubr.bf16.vlgmr.msra.gmra.mxu0 %v466_v17 }
  0x4c   :  { %540 = shalt.err (!%p537_p5)
}
  0x4d   :  { %367 = dma.vmem_to_hbm [thread:$0]  %s365_s3, 32, %s713_s7, [#allocation13]   ;;  %v385_v37 = vld [vmem:[%s708_s2] ss:$0 sm:$0xff] }
  0x4e   :  { %s627_s24 = smov [#allocation8]  }
  0x4f   :  { %s331_s25 = sshll.u32 %s627_s24, 4  ;;  %s332_s25 = int_to_ptr.vmem [resolvable:$true] %s331_s25 }
  0x50   :  { %s549_s2 = scalar_lea.vmem %s332_s25, 128  ;;  %p554_p7 = scmp.lt.s32.totalorder %s332_s25, %s332_s25 }
  0x51   :  { %p550_p6 = scmp.ne.s32.totalorder %s332_s25, %s549_s2  ;;  %p555_p8 = scmp.lt.s32.totalorder %s549_s2, %s549_s2 }
  0x53   :  { %p556_p9 = por %p555_p8, %p554_p7 }
  0x55   :  { %p557_p10 = pnand %p556_p9, %p550_p6 }
 0x10b   :  { %v433_v36 = vpop.f32.mrf.mxu0 }
 0x10d   :  { %v434_v38 = vpop.f32.mrf.mxu0 }
 0x10e   :  { %v435_v39 = vadd.f32 %v434_v38, %v433_v36 }
 0x10f   :  { %v436_v40 = vpop.f32.mrf.mxu0 }
 0x110   :  { %v248_v41 = vadd.f32 %v435_v39, %v385_v37 }
 0x111   :  { %v437_v42 = vpop.f32.mrf.mxu0 }
 0x112   :  { %v268_v43 = vmul.f32 %v415_v20, %v248_v41  ;;  %v288_v44 = vmul.f32 %v248_v41, %v248_v41  ;;  %v438_v45 = vadd.f32 %v437_v42, %v436_v40 }
 0x114   :  { %v270_v46 = vrot.slane %v268_v43, 4  ;;  %v290_v47 = vrot.slane %v288_v44, 4  ;;  %v251_v48 = vadd.f32 %v438_v45, %v385_v37 }
 0x116   :  { %v271_v49 = vadd.f32 %v270_v46, %v268_v43  ;;  %v291_v50 = vadd.f32 %v290_v47, %v288_v44  ;;  %v269_v51 = vmul.f32 %v416_v19, %v251_v48  ;;  %v289_v52 = vmul.f32 %v251_v48, %v251_v48 }
 0x117   :  { %v411_v53 = vpack.c.bf16 %v251_v48, %v248_v41 }
 0x118   :  { %v272_v54 = vrot.slane %v271_v49, 2  ;;  %v292_v55 = vrot.slane %v291_v50, 2  ;;  %v276_v56 = vrot.slane %v269_v51, 4  ;;  %v296_v57 = vrot.slane %v289_v52, 4 }
 0x119   :  { %412 = vst [vmem:[#allocation8] sm:$0xff] %v411_v53  }
 0x11a   :  { %v277_v58 = vadd.f32 %v276_v56, %v269_v51  ;;  %v297_v59 = vadd.f32 %v296_v57, %v289_v52  ;;  %v273_v60 = vadd.f32 %v272_v54, %v271_v49 }
 0x11b   :  { %560 = shalt.err (!%p557_p10)
}
 0x11c   :  { %337 = dma.vmem_to_hbm [thread:$0]  %s332_s25, 128, %s710_s4, [#allocation4], %s620_s27, %s620_s27, %s621_s28   ;;  %v293_v61 = vadd.f32 %v292_v55, %v291_v50  ;;  %v278_v62 = vrot.slane %v277_v58, 2  ;;  %v298_v63 = vrot.slane %v297_v59, 2  ;;  %v274_v0 = vrot.slane %v273_v60, 1 }
 0x11d   :  { %s628_s29 = smov [#allocation9]   ;;  %s629_s8 = smov [#allocation11]  }
 0x11e   :  { %v279_v1 = vadd.f32 %v278_v62, %v277_v58  ;;  %v294_v2 = vrot.slane %v293_v61, 1  ;;  %v299_v3 = vadd.f32 %v298_v63, %v297_v59  ;;  %s344_s30 = sshll.u32 %s628_s29, 4  ;;  %s354_s9 = sshll.u32 %s629_s8, 4  ;;  %v275_v6 = vadd.f32 %v274_v0, %v273_v60  ;;  %s345_s30 = int_to_ptr.vmem [resolvable:$true] %s344_s30  ;;  %s355_s9 = int_to_ptr.vmem [resolvable:$true] %s354_s9 }
 0x11f   :  { %s569_s4 = scalar_lea.vmem %s345_s30, 32  ;;  %p574_p12 = scmp.lt.s32.totalorder %s345_s30, %s345_s30 }
 0x120   :  { %v280_v4 = vrot.slane %v279_v1, 1  ;;  %v300_v5 = vrot.slane %v299_v3, 1  ;;  %v295_v8 = vadd.f32 %v294_v2, %v293_v61  ;;  %p570_p11 = scmp.ne.s32.totalorder %s345_s30, %s569_s4  ;;  %p575_p13 = scmp.lt.s32.totalorder %s569_s4, %s569_s4 }
 0x122   :  { %v281_v7 = vadd.f32 %v280_v4, %v279_v1  ;;  %v301_v9 = vadd.f32 %v300_v5, %v299_v3  ;;  %p576_p0 = por %p575_p13, %p574_p12 }
 0x124   :  { %v285_v10 = vsel %vm284_vm0, %v281_v7, %v275_v6  ;;  %v304_v11 = vsel %vm284_vm0, %v301_v9, %v295_v8  ;;  %p577_p1 = pnand %p576_p0, %p570_p11 }
 0x125   :  { %287 = vst [vmem:[#allocation9] sm:$0x3] %v285_v10  ;;  %306 = vst [vmem:[#allocation11] sm:$0x3] %v304_v11 }
 0x126   :  { %580 = shalt.err (!%p577_p1)
}
 0x127   :  { %347 = dma.vmem_to_hbm [thread:$0]  %s345_s30, 32, %s711_s5, [#allocation10]  }
 0x128   :  { %s589_s10 = scalar_lea.vmem %s355_s9, 32  ;;  %p594_p3 = scmp.lt.s32.totalorder %s355_s9, %s355_s9 }
 0x129   :  { %p590_p2 = scmp.ne.s32.totalorder %s355_s9, %s589_s10  ;;  %p595_p4 = scmp.lt.s32.totalorder %s589_s10, %s589_s10 }
 0x12b   :  { %p596_p5 = por %p595_p4, %p594_p3 }
 0x12d   :  { %p597_p6 = pnand %p596_p5, %p590_p2 }
 0x12f   :  { %600 = shalt.err (!%p597_p6)
}
 0x130   :  { %357 = dma.vmem_to_hbm [thread:$0]  %s355_s9, 32, %s712_s6, [#allocation10]  }
 0x131   :  { %613 = dma.done.wait [#allocation4], 128  }
 0x132   :  { %614 = vsyncadd [#allocation4], 4294967168 }
 0x133   :  { %615 = dma.done.wait [#allocation10], 64  }
 0x134   :  { %616 = vsyncadd [#allocation10], 4294967232 }
 0x135   :  { %617 = dma.done.wait [#allocation13], 32  }
 0x136   :  { %618 = vsyncadd [#allocation13], 4294967264 }
 0x137   :  { %380 = vsyncpa [#allocation3], 1 }
 0x138   :  { %381 = vsyncpa [#allocation6], 1 }
 0x139   :  { %382 = vsyncpa [#allocation4], 1 }
 0x13a   :  { %383 = vsyncpa [#allocation10], 1 }
 0x13b   :  { %384 = vsyncpa [#allocation13], 1 }

</bundles_post_ra>
